<compile_context>
chip_gen: v7x
topology: tpu7x:2x2x1
jax: 0.10.0
libtpu: 0.0.40
codegen_flags: <defaults>
</compile_context>

<pallas_src>
import jax
import jax.numpy as jnp
import numpy as np
from jax import lax
from jax.experimental import pallas as pl
from jax.experimental.pallas import tpu as pltpu

_VMEM_BUDGET = 32 * 1024 * 1024  # conservative scoped-VMEM budget across v5e/v6e/v7x


def _round_up(x, m):
    return ((x + m - 1) // m) * m


def _gd_kernel_direct(x_ref, w_ref, o_ref):
    # (TM, P) @ (P, C_pad128) -> (TM, C_pad128), fp32 accumulation on the MXU.
    o_ref[...] = jnp.dot(
        x_ref[...], w_ref[...], preferred_element_type=jnp.float32
    ).astype(o_ref.dtype)


def _gd_kernel_transposed(x_ref, wt_ref, o_ref):
    # out^T tile (C_r8, TM) = W^T (C_r8, P) contracted with X (TM, P) over P
    # (contraction on both last dims == matmul with transposed RHS; output is
    #  lane-dense along M, avoiding 128-lane padding of a tiny child dim).
    o_ref[...] = lax.dot_general(
        wt_ref[...], x_ref[...],
        dimension_numbers=(((1,), (1,)), ((), ())),
        preferred_element_type=jnp.float32,
    ).astype(o_ref.dtype)


def _choose_tile_m(M, per_row_bytes, resident_bytes, tile_m_cap, vmem_budget):
    """Largest row tile whose double-buffered X/O tiles fit the VMEM budget,
    rounded to 128, balanced over the grid, and split >=2 ways for large M so
    v7x's two TensorCores both get work."""
    avail = vmem_budget - resident_bytes - (1 << 20)          # ~1 MiB headroom
    tm_fit = max(128, (avail // max(per_row_bytes, 1)) // 128 * 128)
    tm = max(128, min(_round_up(tile_m_cap, 128), tm_fit))
    if M <= tm:
        if M >= 512:                       # keep >=2 "parallel" grid steps (v7x megacore)
            return _round_up(pl.cdiv(M, 2), 128)
        return M                           # single full-extent tile (block == full dim is legal)
    n_tiles = pl.cdiv(M, tm)
    # Balance tiles so the ragged last block is not pathologically small.
    return min(tm, _round_up(pl.cdiv(M, n_tiles), 128))


def graph_downsampling(x, w, *, out_dtype=jnp.float32, tile_m=1024,
                        vmem_budget=_VMEM_BUDGET):
    """out[b, c, :] = x[b, c, :] @ w, with w = D_T @ A_eff (parent, child).

    x: (B, Ch, parent) float32.  Returns (B, Ch, child) in `out_dtype`
    (fp32 by default, matching the PyTorch module; bf16 halves writeback).
    For method=NO_A pass w = D_T (A_eff = I).
    """
    B, Ch, P = x.shape
    P_w, C = w.shape
    assert P_w == P, "weight parent dim must match input"
    M = B * Ch

    x2d = x.reshape(M, P)                       # metadata-only; no HBM pass
    w = w.astype(jnp.float32)                   # weights stay full precision (VMEM-resident)
    in_itemsize = jnp.dtype(x2d.dtype).itemsize
    out_itemsize = jnp.dtype(out_dtype).itemsize

    C_r8 = _round_up(C, 8)
    C_p128 = _round_up(C, 128)
    # Transposed-output layout wins when padding C to 128 lanes would inflate the
    # (dominant) output writeback more than the store + caller transpose (~3x C_r8).
    transposed_out = 3 * C_r8 < C_p128

    if transposed_out:
        w_arr = jnp.pad(w.T, ((0, C_r8 - C), (0, 0))) if C_r8 != C else w.T  # (C_r8, P)
        w_block = (C_r8, P)
        c_block = C_r8
        kernel = _gd_kernel_transposed
    else:
        w_arr = jnp.pad(w, ((0, 0), (0, C_p128 - C))) if C_p128 != C else w  # (P, C_p128)
        w_block = (P, C_p128)
        c_block = C_p128
        kernel = _gd_kernel_direct

    resident = 2 * w_arr.size * 4               # conservative: assume W double-buffered
    per_row = 2 * P * in_itemsize + 2 * c_block * out_itemsize
    TM = _choose_tile_m(M, per_row, resident, tile_m, vmem_budget)
    grid = (pl.cdiv(M, TM),)

    if transposed_out:
        out_shape = jax.ShapeDtypeStruct((C_r8, M), out_dtype)
        x_spec = pl.BlockSpec((TM, P), lambda i: (i, 0))
        out_spec = pl.BlockSpec((C_r8, TM), lambda i: (0, i))
        out_elems = C_r8 * M
    else:
        out_shape = jax.ShapeDtypeStruct((M, C_p128), out_dtype)
        x_spec = pl.BlockSpec((TM, P), lambda i: (i, 0))
        out_spec = pl.BlockSpec((TM, C_p128), lambda i: (i, 0))
        out_elems = M * C_p128

    cost = pl.CostEstimate(
        flops=2 * M * P * c_block,
        transcendentals=0,
        bytes_accessed=M * P * in_itemsize + w_arr.size * 4 + out_elems * out_itemsize,
    )

    def call(w_pipeline_mode):
        if w_pipeline_mode is None:
            w_spec = pl.BlockSpec(w_block, lambda i: (0, 0))
        else:
            # Constant index_map -> one VMEM copy of W is enough (frees VMEM for TM).
            w_spec = pl.BlockSpec(w_block, lambda i: (0, 0),
                                  pipeline_mode=w_pipeline_mode)
        return pl.pallas_call(
            kernel,
            out_shape=out_shape,
            grid=grid,
            in_specs=[x_spec, w_spec],
            out_specs=out_spec,
            compiler_params=pltpu.CompilerParams(
                dimension_semantics=("parallel",),
                vmem_limit_bytes=vmem_budget,
            ),
            cost_estimate=cost,
        )(x2d, w_arr)

    try:
        out2d = call(pl.Buffered(1))
    except Exception:
        # pipeline_mode on pallas_call BlockSpecs unsupported on this build:
        # fall back to default double-buffering of W (costs w_arr.size*4 extra VMEM).
        out2d = call(None)

    if transposed_out:
        if C_r8 != C:
            out2d = out2d[:C, :]
        return out2d.T.reshape(B, Ch, C)        # small: only M*C elements
    if C_p128 != C:
        out2d = out2d[:, :C]
    return out2d.reshape(B, Ch, C)


def build_params(parent_size, child_size, gamma=0.5, seed=0):
    """Deterministic synthetic D (child x parent), A (child x child) and folded W."""
    rng = np.random.default_rng(seed)

    # D: binary membership — each parent node belongs to one child cluster.
    D = np.zeros((child_size, parent_size), dtype=np.float64)
    ratio = max(parent_size // child_size, 1)
    for j in range(parent_size):
        D[min(j // ratio, child_size - 1), j] = 1.0
    row_deg = np.sum(D, 1)
    assert np.all(row_deg > 0), "empty child cluster -> singular degree matrix"
    D_T = (D / row_deg[:, None]).T              # == (inv(diag(sum(D,1))) @ D).T  (parent, child)

    # Symmetric weighted adjacency of the child graph.
    Wadj = rng.uniform(0.1, 1.0, size=(child_size, child_size))
    A = 0.5 * (Wadj + Wadj.T)
    np.fill_diagonal(A, 0.0)
    assert np.allclose(A, A.T)
    col_deg = np.sum(A, 0)
    assert np.all(col_deg > 0), "zero-degree node in A"
    A_norm = A / col_deg[:, None]               # inv(diag(sum(A,0))) @ A
    A_eff = gamma * np.eye(child_size) + (1.0 - gamma) * A_norm   # WEI / BIN

    W = D_T.dot(A_eff)                          # out = X @ D_T @ A_eff = X @ W
    return (jnp.asarray(D_T, jnp.float32),
            jnp.asarray(A_eff, jnp.float32),
            jnp.asarray(W, jnp.float32))


if __name__ == "__main__":
    key = jax.random.PRNGKey(0)

    def run_case(B, Ch, parent_size, child_size, k, tile_m=1024):
        x = jax.random.normal(k, (B, Ch, parent_size), dtype=jnp.float32)
        d_t, a_eff, w = build_params(parent_size, child_size, gamma=0.5, seed=0)
        out = jax.block_until_ready(graph_downsampling(x, w, tile_m=tile_m))
        assert out.shape == (B, Ch, child_size)
        ref = jnp.einsum("bcp,pk,kn->bcn", x, d_t, a_eff)
        # Tolerance covers a possible bf16-pass MXU lowering of the fp32 contraction;
        # structural bugs (wrong fold / transpose / boundary masking) would be O(1).
        assert jnp.allclose(out, ref, atol=2e-2, rtol=2e-2)

    k0, k1, k2 = jax.random.split(key, 3)
    # 1) module-typical small shape -> transposed-output path (child=8 << 128).
    run_case(2, 4, 16, 8, k0)
    # 2) ragged M with >1 grid step -> exercises the masked boundary tile.
    run_case(2, 96, 16, 8, k1, tile_m=128)
    # 3) larger child dim -> direct lane-padded path with trailing-column slice.
    run_case(2, 4, 64, 48, k2)

    print("KERNEL_OK")
</pallas_src>

<mosaic_0001>
module attributes {stable_mosaic.version = 11 : i64} {
  func.func @_gd_kernel_transposed(%arg0: i32, %arg1: memref<8x16xf32, #tpu.memory_space<vmem>>, %arg2: memref<8x16xf32, #tpu.memory_space<vmem>>, %arg3: memref<8x8xf32, #tpu.memory_space<vmem>>) attributes {dimension_semantics = [#tpu.dimension_semantics<parallel>], iteration_bounds = array<i64: 1>, scalar_prefetch = 0 : i64, scratch_operands = 0 : i64, tpu.core_type = #tpu.core_type<tc>, window_params = [{transform_indices = @transform_0, window_bounds = array<i64: 8, 16>}, {pipeline_mode = #tpu.pipeline_mode<synchronous>, transform_indices = @transform_1, window_bounds = array<i64: 8, 16>}, {transform_indices = @transform_2, window_bounds = array<i64: 8, 8>}]} {
    %c0 = arith.constant 0 : index
    %c0_0 = arith.constant 0 : index
    %0 = vector.load %arg2[%c0, %c0_0] : memref<8x16xf32, #tpu.memory_space<vmem>>, vector<8x16xf32>
    %c0_1 = arith.constant 0 : index
    %c0_2 = arith.constant 0 : index
    %1 = vector.load %arg1[%c0_1, %c0_2] : memref<8x16xf32, #tpu.memory_space<vmem>>, vector<8x16xf32>
    %cst = arith.constant dense<0.000000e+00> : vector<8x8xf32>
    %2 = tpu.matmul %0, %1, %cst {dimension_numbers = #tpu.dot_dimension_numbers<[1], [1], [0], [0], [0, 0, 1, 0], [], []>} : vector<8x16xf32>, vector<8x16xf32>, vector<8x8xf32> -> vector<8x8xf32>
    %c0_3 = arith.constant 0 : index
    %c0_4 = arith.constant 0 : index
    %3 = vector.load %arg3[%c0_3, %c0_4] : memref<8x8xf32, #tpu.memory_space<vmem>>, vector<8x8xf32>
    tpu.vector_store %arg3[%c0_3, %c0_4], %2 {strides = array<i32>} : memref<8x8xf32, #tpu.memory_space<vmem>>, vector<8x8xf32>,
    return
  }
  func.func @transform_0(%arg0: i32) -> (i32, i32) {
    %c0_i32 = arith.constant 0 : i32
    %c0_i32_0 = arith.constant 0 : i32
    return %arg0, %c0_i32 : i32, i32
  }
  func.func @transform_1(%arg0: i32) -> (i32, i32) {
    %c0_i32 = arith.constant 0 : i32
    %c0_i32_0 = arith.constant 0 : i32
    %c0_i32_1 = arith.constant 0 : i32
    return %c0_i32, %c0_i32_0 : i32, i32
  }
  func.func @transform_2(%arg0: i32) -> (i32, i32) {
    %c0_i32 = arith.constant 0 : i32
    %c0_i32_0 = arith.constant 0 : i32
    return %c0_i32, %arg0 : i32, i32
  }
}

module attributes {stable_mosaic.version = 11 : i64} {
  func.func @_gd_kernel_transposed(%arg0: i32, %arg1: memref<8x16xf32, #tpu.memory_space<vmem>>, %arg2: memref<8x16xf32, #tpu.memory_space<vmem>>, %arg3: memref<8x8xf32, #tpu.memory_space<vmem>>) attributes {dimension_semantics = [#tpu.dimension_semantics<parallel>], iteration_bounds = array<i64: 1>, scalar_prefetch = 0 : i64, scratch_operands = 0 : i64, tpu.core_type = #tpu.core_type<tc>, window_params = [{transform_indices = @transform_0, window_bounds = array<i64: 8, 16>}, {pipeline_mode = #tpu.pipeline_mode<synchronous>, transform_indices = @transform_1, window_bounds = array<i64: 8, 16>}, {transform_indices = @transform_2, window_bounds = array<i64: 8, 8>}]} {
    %c0 = arith.constant 0 : index
    %c0_0 = arith.constant 0 : index
    %0 = vector.load %arg2[%c0, %c0_0] : memref<8x16xf32, #tpu.memory_space<vmem>>, vector<8x16xf32>
    %c0_1 = arith.constant 0 : index
    %c0_2 = arith.constant 0 : index
    %1 = vector.load %arg1[%c0_1, %c0_2] : memref<8x16xf32, #tpu.memory_space<vmem>>, vector<8x16xf32>
    %cst = arith.constant dense<0.000000e+00> : vector<8x8xf32>
    %2 = tpu.matmul %0, %1, %cst {dimension_numbers = #tpu.dot_dimension_numbers<[1], [1], [0], [0], [0, 0, 1, 0], [], []>} : vector<8x16xf32>, vector<8x16xf32>, vector<8x8xf32> -> vector<8x8xf32>
    %c0_3 = arith.constant 0 : index
    %c0_4 = arith.constant 0 : index
    %3 = vector.load %arg3[%c0_3, %c0_4] : memref<8x8xf32, #tpu.memory_space<vmem>>, vector<8x8xf32>
    tpu.vector_store %arg3[%c0_3, %c0_4], %2 {strides = array<i32>} : memref<8x8xf32, #tpu.memory_space<vmem>>, vector<8x8xf32>,
    return
  }
  func.func @transform_0(%arg0: i32) -> (i32, i32) {
    %c0_i32 = arith.constant 0 : i32
    %c0_i32_0 = arith.constant 0 : i32
    return %arg0, %c0_i32 : i32, i32
  }
  func.func @transform_1(%arg0: i32) -> (i32, i32) {
    %c0_i32 = arith.constant 0 : i32
    %c0_i32_0 = arith.constant 0 : i32
    %c0_i32_1 = arith.constant 0 : i32
    return %c0_i32, %c0_i32_0 : i32, i32
  }
  func.func @transform_2(%arg0: i32) -> (i32, i32) {
    %c0_i32 = arith.constant 0 : i32
    %c0_i32_0 = arith.constant 0 : i32
    return %c0_i32, %arg0 : i32, i32
  }
}

</mosaic_0001>

<bundles_post_ra>
// kernel: tpu_custom_call.1
= control target key start
LH: loop header
LB: loop body
LE: loop exit
PB: predicated region body
PF: predicated region fallthrough
CT: control target
= control target key end

     0   :  { %7 = vsyncpa [#allocation3], 0  ;;  %s275_s0 = inlined_call_operand.hbm [shape: f32[8,16], index: 0, kind: input, shape index: {}]   ;;  %s276_s1 = inlined_call_operand.hbm [shape: f32[8,16], index: 1, kind: input, shape index: {}]   ;;  %s277_s2 = inlined_call_operand.hbm [shape: f32[8,8], index: 2, kind: output, shape index: {}]  }
   0x1   :  { %8 = vsyncpa [#allocation6], 0 }
   0x2   :  { %9 = vsyncpa [#allocation4], 0  ;;  %s219_s9 = smov [#allocation2]   ;;  %s220_s11 = smov [#allocation5]  }
   0x3   :  { %s16_s10 = sshll.u32 %s219_s9, 4  ;;  %s26_s12 = sshll.u32 %s220_s11, 4  ;;  %s17_s10 = int_to_ptr.vmem [resolvable:$true] %s16_s10  ;;  %s27_s12 = int_to_ptr.vmem [resolvable:$true] %s26_s12 }
   0x4   :  { %s147_s15 = scalar_lea.hbm %s275_s0, 128 }
   0x5   :  { %p148_p0 = scmp.ne.s32.totalorder %s275_s0, %s147_s15  ;;  %p151_p1 = scmp.lt.u32.totalorder %s147_s15, %s275_s0 }
   0x7   :  { %p153_p2 = pnand %p151_p1, %p148_p0 }
   0x9   :  { %156 = shalt.err (!%p153_p2)
}
   0xa   :  { %s157_s20 = scalar_lea.vmem %s17_s10, 128  ;;  %p162_p4 = scmp.lt.s32.totalorder %s17_s10, %s17_s10 }
   0xb   :  { %p158_p3 = scmp.ne.s32.totalorder %s17_s10, %s157_s20  ;;  %p163_p5 = scmp.lt.s32.totalorder %s157_s20, %s157_s20 }
   0xd   :  { %p164_p6 = por %p163_p5, %p162_p4 }
   0xf   :  { %p165_p7 = pnand %p164_p6, %p158_p3 }
  0x11   :  { %168 = shalt.err (!%p165_p7)
}
  0x12   :  { %19 = dma.hbm_to_vmem [thread:$0]  %s275_s0, 128, %s17_s10, [#allocation3]  }
  0x13   :  { %s169_s25 = scalar_lea.hbm %s276_s1, 128 }
  0x14   :  { %p170_p8 = scmp.ne.s32.totalorder %s276_s1, %s169_s25  ;;  %p173_p9 = scmp.lt.u32.totalorder %s169_s25, %s276_s1 }
  0x16   :  { %p175_p10 = pnand %p173_p9, %p170_p8 }
  0x18   :  { %178 = shalt.err (!%p175_p10)
}
  0x19   :  { %s179_s30 = scalar_lea.vmem %s27_s12, 128  ;;  %p184_p12 = scmp.lt.s32.totalorder %s27_s12, %s27_s12 }
  0x1a   :  { %p180_p11 = scmp.ne.s32.totalorder %s27_s12, %s179_s30  ;;  %p185_p13 = scmp.lt.s32.totalorder %s179_s30, %s179_s30 }
  0x1c   :  { %p186_p0 = por %p185_p13, %p184_p12 }
  0x1e   :  { %p187_p1 = pnand %p186_p0, %p180_p11 }
  0x20   :  { %190 = shalt.err (!%p187_p1)
}
  0x21   :  { %29 = dma.hbm_to_vmem [thread:$0]  %s276_s1, 128, %s27_s12, [#allocation6]  }
  0x22   :  { %213 = dma.done.wait [#allocation3], 128  }
  0x23   :  { %214 = vsyncadd [#allocation3], 4294967168 }
  0x24   :  { %215 = dma.done.wait [#allocation6], 128  }
  0x25   :  { %216 = vsyncadd [#allocation6], 4294967168  ;;  %v221_v0 = vmov 0.0   ;;  %vm222_vm0 = vmmov 0   ;;  %vm38_vm1 = vcmask 130048   ;;  %v37_v1 = vld [vmem:[#allocation2] sm:$0xff] }
  0x26   :  { %137 = vmatprep.subr.mxu0 %v221_v0  ;;  %139 = vmatprep.mubr.msk.f32.mxu0 %vm222_vm0, %v221_v0  ;;  %v36_v2 = vld [vmem:[#allocation5] sm:$0xff]  ;;  %s223_s4 = smov [#allocation7]   ;;  %vm115_vm2 = vcmask 64512  }
  0x27   :  { %138 = vmatpush3.xpose.msk.msra.mxu0 %vm38_vm1, %v37_v1  ;;  %s123_s5 = sshll.u32 %s223_s4, 4  ;;  %s124_s5 = int_to_ptr.vmem [resolvable:$true] %s123_s5 }
  0x28   :  { %s191_s1 = scalar_lea.vmem %s124_s5, 128  ;;  %p196_p3 = scmp.lt.s32.totalorder %s124_s5, %s124_s5 }
  0x29   :  { %p192_p2 = scmp.ne.s32.totalorder %s124_s5, %s191_s1  ;;  %p197_p4 = scmp.lt.s32.totalorder %s191_s1, %s191_s1 }
  0x2a   :  { %140 = vmatmul.mubr.msk.f32.vlgmr.msra.gmra.mrb[0].mxu0 %vm38_vm1, %v36_v2 }
  0x2b   :  { %p198_p5 = por %p197_p4, %p196_p3 }
  0x2d   :  { %p199_p6 = pnand %p198_p5, %p192_p2 }
  0xfd   :  { %v111_v3 = vpop.f32.mrb[0].mxu0 }
  0xfe   :  { %v141_v4 = vpop.f32.mrb[1].mxu0  ;;  %116 = vst.msk [vmem:[#allocation7] sm:$0xff] %vm115_vm2, %v111_v3 }
  0xff   :  { %202 = shalt.err (!%p199_p6)
}
 0x100   :  { %s203_s8 = scalar_lea.hbm %s277_s2, 128 }
 0x101   :  { %p204_p7 = scmp.ne.s32.totalorder %s277_s2, %s203_s8  ;;  %p207_p8 = scmp.lt.u32.totalorder %s203_s8, %s277_s2 }
 0x103   :  { %p209_p9 = pnand %p207_p8, %p204_p7 }
 0x105   :  { %212 = shalt.err (!%p209_p9)
}
 0x106   :  { %126 = dma.vmem_to_hbm [thread:$0]  %s124_s5, 128, %s277_s2, [#allocation4]  }
 0x107   :  { %217 = dma.done.wait [#allocation4], 128  }
 0x108   :  { %218 = vsyncadd [#allocation4], 4294967168 }
 0x109   :  { %130 = vsyncpa [#allocation3], 1 }
 0x10a   :  { %131 = vsyncpa [#allocation6], 1 }
 0x10b   :  { %132 = vsyncpa [#allocation4], 1 }

// kernel: tpu_custom_call.1
= control target key start
LH: loop header
LB: loop body
LE: loop exit
PB: predicated region body
PF: predicated region fallthrough
CT: control target
= control target key end

     0   :  { %7 = vsyncpa [#allocation3], 0  ;;  %s275_s0 = inlined_call_operand.hbm [shape: f32[8,16], index: 0, kind: input, shape index: {}]   ;;  %s276_s1 = inlined_call_operand.hbm [shape: f32[8,16], index: 1, kind: input, shape index: {}]   ;;  %s277_s2 = inlined_call_operand.hbm [shape: f32[8,8], index: 2, kind: output, shape index: {}]  }
   0x1   :  { %8 = vsyncpa [#allocation6], 0 }
   0x2   :  { %9 = vsyncpa [#allocation4], 0  ;;  %s219_s9 = smov [#allocation2]   ;;  %s220_s11 = smov [#allocation5]  }
   0x3   :  { %s16_s10 = sshll.u32 %s219_s9, 4  ;;  %s26_s12 = sshll.u32 %s220_s11, 4  ;;  %s17_s10 = int_to_ptr.vmem [resolvable:$true] %s16_s10  ;;  %s27_s12 = int_to_ptr.vmem [resolvable:$true] %s26_s12 }
   0x4   :  { %s147_s15 = scalar_lea.hbm %s275_s0, 128 }
   0x5   :  { %p148_p0 = scmp.ne.s32.totalorder %s275_s0, %s147_s15  ;;  %p151_p1 = scmp.lt.u32.totalorder %s147_s15, %s275_s0 }
   0x7   :  { %p153_p2 = pnand %p151_p1, %p148_p0 }
   0x9   :  { %156 = shalt.err (!%p153_p2)
}
   0xa   :  { %s157_s20 = scalar_lea.vmem %s17_s10, 128  ;;  %p162_p4 = scmp.lt.s32.totalorder %s17_s10, %s17_s10 }
   0xb   :  { %p158_p3 = scmp.ne.s32.totalorder %s17_s10, %s157_s20  ;;  %p163_p5 = scmp.lt.s32.totalorder %s157_s20, %s157_s20 }
   0xd   :  { %p164_p6 = por %p163_p5, %p162_p4 }
   0xf   :  { %p165_p7 = pnand %p164_p6, %p158_p3 }
  0x11   :  { %168 = shalt.err (!%p165_p7)
}
  0x12   :  { %19 = dma.hbm_to_vmem [thread:$0]  %s275_s0, 128, %s17_s10, [#allocation3]  }
  0x13   :  { %s169_s25 = scalar_lea.hbm %s276_s1, 128 }
  0x14   :  { %p170_p8 = scmp.ne.s32.totalorder %s276_s1, %s169_s25  ;;  %p173_p9 = scmp.lt.u32.totalorder %s169_s25, %s276_s1 }
  0x16   :  { %p175_p10 = pnand %p173_p9, %p170_p8 }
  0x18   :  { %178 = shalt.err (!%p175_p10)
}
  0x19   :  { %s179_s30 = scalar_lea.vmem %s27_s12, 128  ;;  %p184_p12 = scmp.lt.s32.totalorder %s27_s12, %s27_s12 }
  0x1a   :  { %p180_p11 = scmp.ne.s32.totalorder %s27_s12, %s179_s30  ;;  %p185_p13 = scmp.lt.s32.totalorder %s179_s30, %s179_s30 }
  0x1c   :  { %p186_p0 = por %p185_p13, %p184_p12 }
  0x1e   :  { %p187_p1 = pnand %p186_p0, %p180_p11 }
  0x20   :  { %190 = shalt.err (!%p187_p1)
}
  0x21   :  { %29 = dma.hbm_to_vmem [thread:$0]  %s276_s1, 128, %s27_s12, [#allocation6]  }
  0x22   :  { %213 = dma.done.wait [#allocation3], 128  }
  0x23   :  { %214 = vsyncadd [#allocation3], 4294967168 }
  0x24   :  { %215 = dma.done.wait [#allocation6], 128  }
  0x25   :  { %216 = vsyncadd [#allocation6], 4294967168  ;;  %v221_v0 = vmov 0.0   ;;  %vm222_vm0 = vmmov 0   ;;  %vm38_vm1 = vcmask 130048   ;;  %v37_v1 = vld [vmem:[#allocation2] sm:$0xff] }
  0x26   :  { %137 = vmatprep.subr.mxu0 %v221_v0  ;;  %139 = vmatprep.mubr.msk.f32.mxu0 %vm222_vm0, %v221_v0  ;;  %v36_v2 = vld [vmem:[#allocation5] sm:$0xff]  ;;  %s223_s4 = smov [#allocation7]   ;;  %vm115_vm2 = vcmask 64512  }
  0x27   :  { %138 = vmatpush3.xpose.msk.msra.mxu0 %vm38_vm1, %v37_v1  ;;  %s123_s5 = sshll.u32 %s223_s4, 4  ;;  %s124_s5 = int_to_ptr.vmem [resolvable:$true] %s123_s5 }
  0x28   :  { %s191_s1 = scalar_lea.vmem %s124_s5, 128  ;;  %p196_p3 = scmp.lt.s32.totalorder %s124_s5, %s124_s5 }
  0x29   :  { %p192_p2 = scmp.ne.s32.totalorder %s124_s5, %s191_s1  ;;  %p197_p4 = scmp.lt.s32.totalorder %s191_s1, %s191_s1 }
  0x2a   :  { %140 = vmatmul.mubr.msk.f32.vlgmr.msra.gmra.mrb[0].mxu0 %vm38_vm1, %v36_v2 }
  0x2b   :  { %p198_p5 = por %p197_p4, %p196_p3 }
  0x2d   :  { %p199_p6 = pnand %p198_p5, %p192_p2 }
  0xfd   :  { %v111_v3 = vpop.f32.mrb[0].mxu0 }
  0xfe   :  { %v141_v4 = vpop.f32.mrb[1].mxu0  ;;  %116 = vst.msk [vmem:[#allocation7] sm:$0xff] %vm115_vm2, %v111_v3 }
  0xff   :  { %202 = shalt.err (!%p199_p6)
}
 0x100   :  { %s203_s8 = scalar_lea.hbm %s277_s2, 128 }
 0x101   :  { %p204_p7 = scmp.ne.s32.totalorder %s277_s2, %s203_s8  ;;  %p207_p8 = scmp.lt.u32.totalorder %s203_s8, %s277_s2 }
 0x103   :  { %p209_p9 = pnand %p207_p8, %p204_p7 }
 0x105   :  { %212 = shalt.err (!%p209_p9)
}
 0x106   :  { %126 = dma.vmem_to_hbm [thread:$0]  %s124_s5, 128, %s277_s2, [#allocation4]  }
 0x107   :  { %217 = dma.done.wait [#allocation4], 128  }
 0x108   :  { %218 = vsyncadd [#allocation4], 4294967168 }
 0x109   :  { %130 = vsyncpa [#allocation3], 1 }
 0x10a   :  { %131 = vsyncpa [#allocation6], 1 }
 0x10b   :  { %132 = vsyncpa [#allocation4], 1 }

</bundles_post_ra>
